<compile_context>
chip_gen: v5e
topology: v5e:2x2
jax: 0.10.0
libtpu: 0.0.40
codegen_flags: <defaults>
</compile_context>

<pallas_src>
import functools

import jax
import jax.numpy as jnp
from jax import lax
from jax.experimental import pallas as pl
from jax.experimental.pallas import tpu as pltpu

LANES = 128  # TPU vreg lane width; all padded widths target this


def dueling_dqn_kernel(x_ref, w_ref, b_ref, out_ref, *, gg, hid_pad, n_act):
    """Whole forward pass in one invocation.

    x_ref  : (B, gg)                bf16  flattened input pixels
    w_ref  : (gg + 2*hid_pad, 128)  bf16  packed [w_conv | w_fc1 | w_adv||w_val],
                                          each zero-padded to 128 lanes
    b_ref  : (3, 128)               f32   rows = [b_conv, b_fc1, b_adv||b_val] (zero-padded)
    out_ref: (B, 128)               f32   lane-dense; wrapper slices [:, :n_act]
    """
    x = x_ref[...]

    # Static, tile-aligned views into the packed weight blob (gg and hid_pad
    # are multiples of 16, so slices never cross a bf16 (16,128) tile).
    wc = w_ref[0:gg, :]
    w1 = w_ref[gg:gg + hid_pad, :]
    wav = w_ref[gg + hid_pad:gg + 2 * hid_pad, :]

    b = b_ref[...]
    bc, b1, bav = b[0:1, :], b[1:2, :], b[2:3, :]

    # "conv" with kernel_size == game_size == FC over flattened pixels.
    # Matmuls: bf16 operands, f32 MXU accumulation; elementwise stays f32.
    h0 = jnp.dot(x, wc, preferred_element_type=jnp.float32) + bc
    h1 = jnp.maximum(
        jnp.dot(h0.astype(jnp.bfloat16), w1, preferred_element_type=jnp.float32) + b1,
        0.0)
    # Fused advantage + value head: cols [0, n_act) = adv, col n_act = val, rest 0.
    y = jnp.dot(h1.astype(jnp.bfloat16), wav, preferred_element_type=jnp.float32) + bav

    col = lax.broadcasted_iota(jnp.int32, y.shape, 1)
    # Global mean over batch AND actions — matches torch `adv.mean()` in the module.
    adv_mean = jnp.sum(jnp.where(col < n_act, y, 0.0)) / (y.shape[0] * n_act)
    val = jnp.sum(jnp.where(col == n_act, y, 0.0), axis=-1, keepdims=True)  # (B, 1)

    # Dueling combine, written lane-dense across all 128 lanes (padding lanes
    # hold don't-care values and are sliced away by the wrapper).
    out_ref[...] = val + (y - adv_mean)


def pack_params(params):
    """Pack the 8 f32 parameter tensors into one bf16 weight blob + one f32 bias blob."""
    wc, bc, w1, b1, wa, ba, wv, bv = params
    gg, hid = wc.shape
    act = wa.shape[1]
    assert gg % 16 == 0, "flattened spatial dim must be a multiple of 16 (bf16 sublane tile)"
    assert hid <= LANES and act + 1 <= LANES

    def pad_cols(m):
        return jnp.pad(m, ((0, 0), (0, LANES - m.shape[1])))

    wc_p = pad_cols(wc)                                         # (gg, 128)
    w1_p = jnp.pad(w1, ((0, LANES - hid), (0, LANES - hid)))    # (128, 128)
    wav = jnp.concatenate([wa, wv], axis=1)                     # (hid, act+1)
    wav_p = jnp.pad(wav, ((0, LANES - hid), (0, LANES - (act + 1))))
    w_blob = jnp.concatenate([wc_p, w1_p, wav_p], axis=0).astype(jnp.bfloat16)

    bav = jnp.concatenate([ba, bv], axis=1)                     # (1, act+1)
    b_blob = jnp.concatenate([pad_cols(bc), pad_cols(b1), pad_cols(bav)], axis=0)  # (3,128) f32

    return w_blob, b_blob, gg, act


def dueling_dqn_forward(state, packed):
    """state: (B, 1, G, G) float32, NCHW like PyTorch. Returns (B, action_size) f32."""
    w_blob, b_blob, gg, act = packed
    B = state.shape[0]
    x = state.reshape(B, gg).astype(jnp.bfloat16)

    kernel = functools.partial(dueling_dqn_kernel, gg=gg, hid_pad=LANES, n_act=act)
    out_full = pl.pallas_call(
        kernel,
        out_shape=jax.ShapeDtypeStruct((B, LANES), jnp.float32),
        in_specs=[pl.BlockSpec(memory_space=pltpu.VMEM)] * 3,
        out_specs=pl.BlockSpec(memory_space=pltpu.VMEM),
    )(x, w_blob, b_blob)
    return out_full[:, :act]


def init_params(key, hid_size, game_size, action_size):
    """Deterministic synthetic parameters matching the PyTorch module shapes."""
    ks = jax.random.split(key, 8)
    scale = 0.1
    # conv: weight (hid, 1, G, G) -> flattened & transposed to (G*G, hid)
    conv_w = scale * jax.random.normal(ks[0], (hid_size, 1, game_size, game_size), jnp.float32)
    wc = conv_w.reshape(hid_size, game_size * game_size).T
    bc = scale * jax.random.normal(ks[1], (1, hid_size), jnp.float32)
    # fc1: torch Linear weight (out, in) -> transpose to (in, out)
    w1 = scale * jax.random.normal(ks[2], (hid_size, hid_size), jnp.float32).T
    b1 = scale * jax.random.normal(ks[3], (1, hid_size), jnp.float32)
    # fc_adv
    wa = scale * jax.random.normal(ks[4], (action_size, hid_size), jnp.float32).T
    ba = scale * jax.random.normal(ks[5], (1, action_size), jnp.float32)
    # fc_val
    wv = scale * jax.random.normal(ks[6], (1, hid_size), jnp.float32).T
    bv = scale * jax.random.normal(ks[7], (1, 1), jnp.float32)
    return (wc, bc, w1, b1, wa, ba, wv, bv)


def reference_forward(state, params):
    """Pure-JAX f32 reference of the PyTorch forward (semantics check)."""
    wc, bc, w1, b1, wa, ba, wv, bv = params
    B, _, G, _ = state.shape
    x = state.reshape(B, G * G)
    h0 = x @ wc + bc
    h1 = jnp.maximum(h0 @ w1 + b1, 0.0)
    adv = h1 @ wa + ba
    val = h1 @ wv + bv
    return val + (adv - jnp.mean(adv))


def reference_forward_bf16(state, params):
    """Reference that mimics the kernel's bf16-matmul / f32-accumulate numerics."""
    wc, bc, w1, b1, wa, ba, wv, bv = params
    B, _, G, _ = state.shape
    bf = jnp.bfloat16
    x = state.reshape(B, G * G).astype(bf)
    h0 = jnp.dot(x, wc.astype(bf), preferred_element_type=jnp.float32) + bc
    h1 = jnp.maximum(
        jnp.dot(h0.astype(bf), w1.astype(bf), preferred_element_type=jnp.float32) + b1, 0.0)
    adv = jnp.dot(h1.astype(bf), wa.astype(bf), preferred_element_type=jnp.float32) + ba
    val = jnp.dot(h1.astype(bf), wv.astype(bf), preferred_element_type=jnp.float32) + bv
    return val + (adv - jnp.mean(adv))


if __name__ == "__main__":
    batch = 2
    hid_size = 32
    game_size = 16
    action_size = 8

    key = jax.random.PRNGKey(0)
    k_state, k_params = jax.random.split(key)

    # NCHW input like PyTorch: (B, 1, game_size, game_size)
    state = jax.random.normal(k_state, (batch, 1, game_size, game_size), jnp.float32)
    params = init_params(k_params, hid_size, game_size, action_size)
    packed = pack_params(params)

    out = dueling_dqn_forward(state, packed)
    out = jax.block_until_ready(out)
    assert out.shape == (batch, action_size)

    # Tight check against a reference with identical bf16/f32 numerics.
    ref_bf16 = reference_forward_bf16(state, params)
    assert jnp.allclose(out, ref_bf16, atol=1e-3, rtol=1e-3)

    # Loose sanity check against the full-f32 PyTorch-equivalent reference
    # (difference is only bf16 matmul rounding).
    ref_f32 = reference_forward(state, params)
    assert jnp.allclose(out, ref_f32, atol=5e-2, rtol=5e-2)

    print("KERNEL_OK")
</pallas_src>

<mosaic_0001>
module attributes {stable_mosaic.version = 11 : i64} {
  func.func @dueling_dqn_kernel(%arg0: memref<2x256xbf16, #tpu.memory_space<vmem>>, %arg1: memref<512x128xbf16, #tpu.memory_space<vmem>>, %arg2: memref<3x128xf32, #tpu.memory_space<vmem>>, %arg3: memref<2x128xf32, #tpu.memory_space<vmem>>) attributes {dimension_semantics = [], scalar_prefetch = 0 : i64, scratch_operands = 0 : i64, tpu.core_type = #tpu.core_type<tc>} {
    %c0 = arith.constant 0 : index
    %c0_0 = arith.constant 0 : index
    %0 = vector.load %arg0[%c0, %c0_0] : memref<2x256xbf16, #tpu.memory_space<vmem>>, vector<2x256xbf16>
    %c0_1 = arith.constant 0 : index
    %c0_2 = arith.constant 0 : index
    %1 = vector.load %arg1[%c0_1, %c0_2] : memref<512x128xbf16, #tpu.memory_space<vmem>>, vector<256x128xbf16>
    %c256 = arith.constant 256 : index
    %c0_3 = arith.constant 0 : index
    %2 = vector.load %arg1[%c256, %c0_3] : memref<512x128xbf16, #tpu.memory_space<vmem>>, vector<128x128xbf16>
    %c384 = arith.constant 384 : index
    %c0_4 = arith.constant 0 : index
    %3 = vector.load %arg1[%c384, %c0_4] : memref<512x128xbf16, #tpu.memory_space<vmem>>, vector<128x128xbf16>
    %c0_5 = arith.constant 0 : index
    %c0_6 = arith.constant 0 : index
    %4 = vector.load %arg2[%c0_5, %c0_6] : memref<3x128xf32, #tpu.memory_space<vmem>>, vector<3x128xf32>
    %5 = vector.extract_strided_slice %4 {offsets = [0, 0], sizes = [1, 128], strides = [1, 1]} : vector<3x128xf32> to vector<1x128xf32>
    %6 = vector.extract_strided_slice %4 {offsets = [1, 0], sizes = [1, 128], strides = [1, 1]} : vector<3x128xf32> to vector<1x128xf32>
    %7 = vector.extract_strided_slice %4 {offsets = [2, 0], sizes = [1, 128], strides = [1, 1]} : vector<3x128xf32> to vector<1x128xf32>
    %cst = arith.constant dense<0.000000e+00> : vector<2x128xf32>
    %8 = tpu.matmul %0, %1, %cst {dimension_numbers = #tpu.dot_dimension_numbers<[1], [0], [0], [1], [0, 0, 1, 1], [], []>} : vector<2x256xbf16>, vector<256x128xbf16>, vector<2x128xf32> -> vector<2x128xf32>
    %9 = vector.broadcast %5 : vector<1x128xf32> to vector<2x128xf32>
    %10 = arith.addf %8, %9 : vector<2x128xf32>
    %11 = arith.truncf %10 : vector<2x128xf32> to vector<2x128xbf16>
    %cst_7 = arith.constant dense<0.000000e+00> : vector<2x128xf32>
    %12 = tpu.matmul %11, %2, %cst_7 {dimension_numbers = #tpu.dot_dimension_numbers<[1], [0], [0], [1], [0, 0, 1, 1], [], []>} : vector<2x128xbf16>, vector<128x128xbf16>, vector<2x128xf32> -> vector<2x128xf32>
    %13 = vector.broadcast %6 : vector<1x128xf32> to vector<2x128xf32>
    %14 = arith.addf %12, %13 : vector<2x128xf32>
    %cst_8 = arith.constant 0.000000e+00 : f32
    %15 = vector.broadcast %cst_8 : f32 to vector<2x128xf32>
    %16 = arith.maximumf %14, %15 : vector<2x128xf32>
    %17 = arith.truncf %16 : vector<2x128xf32> to vector<2x128xbf16>
    %cst_9 = arith.constant dense<0.000000e+00> : vector<2x128xf32>
    %18 = tpu.matmul %17, %3, %cst_9 {dimension_numbers = #tpu.dot_dimension_numbers<[1], [0], [0], [1], [0, 0, 1, 1], [], []>} : vector<2x128xbf16>, vector<128x128xbf16>, vector<2x128xf32> -> vector<2x128xf32>
    %19 = vector.broadcast %7 : vector<1x128xf32> to vector<2x128xf32>
    %20 = arith.addf %18, %19 : vector<2x128xf32>
    %21 = tpu.iota {dimensions = array<i32: 1>} : vector<2x128xi32>
    %c8_i32 = arith.constant 8 : i32
    %22 = vector.broadcast %c8_i32 : i32 to vector<2x128xi32>
    %23 = arith.cmpi slt, %21, %22 : vector<2x128xi32>
    %cst_10 = arith.constant 0.000000e+00 : f32
    %24 = vector.broadcast %cst_10 : f32 to vector<2x128xf32>
    %25 = arith.select %23, %20, %24 : vector<2x128xi1>, vector<2x128xf32>
    %26 = vector.shape_cast %25 : vector<2x128xf32> to vector<1x2x128xf32>
    %cst_11 = arith.constant dense<0.000000e+00> : vector<1xf32>
    %27 = vector.multi_reduction <add>, %26, %cst_11 [1, 2] : vector<1x2x128xf32> to vector<1xf32>
    %28 = vector.shape_cast %27 : vector<1xf32> to vector<1x1x1xf32>
    %29 = vector.extract %28[0, 0, 0] : f32 from vector<1x1x1xf32>
    %cst_12 = arith.constant 1.600000e+01 : f32
    %30 = arith.divf %29, %cst_12 : f32
    %c8_i32_13 = arith.constant 8 : i32
    %31 = vector.broadcast %c8_i32_13 : i32 to vector<2x128xi32>
    %32 = arith.cmpi eq, %21, %31 : vector<2x128xi32>
    %cst_14 = arith.constant 0.000000e+00 : f32
    %33 = vector.broadcast %cst_14 : f32 to vector<2x128xf32>
    %34 = arith.select %32, %20, %33 : vector<2x128xi1>, vector<2x128xf32>
    %cst_15 = arith.constant dense<0.000000e+00> : vector<2xf32>
    %35 = vector.multi_reduction <add>, %34, %cst_15 [1] : vector<2x128xf32> to vector<2xf32>
    %36 = vector.shape_cast %35 : vector<2xf32> to vector<2x1xf32>
    %37 = vector.broadcast %30 : f32 to vector<2x128xf32>
    %38 = arith.subf %20, %37 : vector<2x128xf32>
    %39 = vector.broadcast %36 : vector<2x1xf32> to vector<2x128xf32>
    %40 = arith.addf %39, %38 : vector<2x128xf32>
    %c0_16 = arith.constant 0 : index
    %c0_17 = arith.constant 0 : index
    %41 = vector.load %arg3[%c0_16, %c0_17] : memref<2x128xf32, #tpu.memory_space<vmem>>, vector<2x128xf32>
    tpu.vector_store %arg3[%c0_16, %c0_17], %40 {strides = array<i32>} : memref<2x128xf32, #tpu.memory_space<vmem>>, vector<2x128xf32>,
    return
  }
}

</mosaic_0001>

<bundles_post_ra>
// kernel: tpu_custom_call.1
= control target key start
LH: loop header
LB: loop body
LE: loop exit
PB: predicated region body
PF: predicated region fallthrough
CT: control target
= control target key end

     0   :  { %8 = vsyncpa [#allocation3], 0  ;;  %s745_s0 = inlined_call_operand.hbm [shape: bf16[2,256], index: 0, kind: input, shape index: {}]   ;;  %s746_s1 = inlined_call_operand.hbm [shape: bf16[512,128], index: 1, kind: input, shape index: {}]   ;;  %s747_s2 = inlined_call_operand.hbm [shape: f32[3,128], index: 2, kind: input, shape index: {}]   ;;  %s748_s3 = inlined_call_operand.hbm [shape: f32[2,128], index: 3, kind: output, shape index: {}]  }
   0x1   :  { %9 = vsyncpa [#allocation6], 0  ;;  %s26_s14 = sshll.u32 %s746_s1, 4  ;;  %s27_s14 = int_to_ptr.hbm [resolvable:$true] %s26_s14 }
   0x2   :  { %10 = vsyncpa [#allocation4], 0  ;;  %s706_s15 = smov [#allocation5]   ;;  %s16_s19 = sshll.u32 %s745_s0, 4  ;;  %s17_s19 = int_to_ptr.hbm [resolvable:$true] %s16_s19 }
   0x3   :  { %s28_s16 = sshll.u32 %s706_s15, 4  ;;  %s707_s20 = smov 64   ;;  %s29_s16 = int_to_ptr.vmem [resolvable:$true] %s28_s16 }
   0x4   :  { %s708_s21 = smov 4   ;;  %s709_s22 = smov [#allocation2]  }
   0x5   :  { %34 = dma.hbm_to_vmem [thread:$0]  %s27_s14, 4096, %s29_s16, [#allocation6], %s707_s20, %s707_s20, %s708_s21  }
   0x6   :  { %s18_s23 = sshll.u32 %s709_s22, 4  ;;  %s40_s26 = sshll.u32 %s747_s2, 4  ;;  %s19_s23 = int_to_ptr.vmem [resolvable:$true] %s18_s23  ;;  %s41_s26 = int_to_ptr.hbm [resolvable:$true] %s40_s26 }
   0x7   :  { %21 = dma.hbm_to_vmem [thread:$0]  %s17_s19, 32, %s19_s23, [#allocation3]  }
   0x8   :  { %s710_s1 = smov [#allocation7]  }
   0x9   :  { %s42_s27 = sshll.u32 %s710_s1, 4  ;;  %s43_s27 = int_to_ptr.vmem [resolvable:$true] %s42_s27 }
   0xa   :  { %45 = dma.hbm_to_vmem [thread:$0]  %s41_s26, 64, %s43_s27, [#allocation6]  }
   0xb   :  { %700 = dma.done.wait [#allocation3], 32  }
   0xc   :  { %701 = vsyncadd [#allocation3], 4294967264 }
   0xd   :  { %702 = dma.done.wait [#allocation6], 4160  }
   0xe   :  { %703 = vsyncadd [#allocation6], 4294963136  ;;  %v566_v0 = vld [vmem:[#allocation5 + $0x38] sm:$0xff]  ;;  %v565_v2 = vld [vmem:[#allocation5 + $0x30] sm:$0xff]  ;;  %v380_v50 = vlaneseq  ;;  %vm384_vm1 = vcmask 1041408   ;;  %v711_v60 = vmov 16.0  }
   0xf   :  { %v574_v1 = vld [vmem:[#allocation5 + $0x78] sm:$0xff]  ;;  %227 = vmatpush.bf16.msra.mxu0 %v566_v0  ;;  %v573_v3 = vld [vmem:[#allocation5 + $0x70] sm:$0xff]  ;;  %v564_v6 = vld [vmem:[#allocation5 + $0x28] sm:$0xff]  ;;  %602 = vrcp.f32 %v711_v60  ;;  %s712_s29 = smov [#allocation8]   ;;  %s420_s6 = sshll.u32 %s748_s3, 4  ;;  %s421_s6 = int_to_ptr.hbm [resolvable:$true] %s420_s6 }
  0x10   :  { %240 = vmatpush.bf16.msra.mxu1 %v574_v1  ;;  %v58_v4 = vld [vmem:[#allocation2] sm:$0x3]  ;;  %v572_v7 = vld [vmem:[#allocation5 + $0x68] sm:$0xff]  ;;  %v581_v8 = vld [vmem:[#allocation5 + $0xb0] sm:$0xff]  ;;  %v381_v51 = vand.u32 127, %v380_v50  ;;  %s418_s30 = sshll.u32 %s712_s29, 4  ;;  %s419_s30 = int_to_ptr.vmem [resolvable:$true] %s418_s30 }
  0x11   :  { %v582_v5 = vld [vmem:[#allocation5 + $0xb8] sm:$0xff]  ;;  %126 = vst [vmem:[#allocation1] ss:$9 sm:$0xff] %v58_v4  ;;  %v563_v9 = vld [vmem:[#allocation5 + $0x20] sm:$0xff]  ;;  %v580_v11 = vld [vmem:[#allocation5 + $0xa8] sm:$0xff] }
  0x12   :  { %303 = vmatpush.bf16.msra.mxu2 %v582_v5  ;;  %v571_v10 = vld [vmem:[#allocation5 + $0x60] sm:$0xff]  ;;  %v562_v12 = vld [vmem:[#allocation5 + $0x18] sm:$0xff]  ;;  %v561_v15 = vld [vmem:[#allocation5 + $0x10] sm:$0xff]  ;;  %vm382_vm0 = vcmp.lt.s32.totalorder %v381_v51, 8  ;;  %vm404_vm2 = vcmp.eq.s32.totalorder %v381_v51, 8 }
  0x13   :  { %228 = vmatpush.bf16.msra.mxu0 %v565_v2  ;;  %v570_v13 = vld [vmem:[#allocation5 + $0x58] sm:$0xff]  ;;  %v579_v14 = vld [vmem:[#allocation5 + $0xa0] sm:$0xff]  ;;  %v569_v16 = vld [vmem:[#allocation5 + $0x50] sm:$0xff] }
  0x14   :  { %241 = vmatpush.bf16.msra.mxu1 %v573_v3  ;;  %v578_v17 = vld [vmem:[#allocation5 + $0x98] sm:$0xff]  ;;  %v560_v18 = vld [vmem:[#allocation5 + $0x8] sm:$0xff]  ;;  %v577_v20 = vld [vmem:[#allocation5 + $0x90] sm:$0xff] }
  0x15   :  { %v568_v19 = vld [vmem:[#allocation5 + $0x48] sm:$0xff]  ;;  %v559_v21 = vld [vmem:[#allocation5] sm:$0xff]  ;;  %v590_v27 = vld [vmem:[#allocation5 + $0xf8] sm:$0xff]  ;;  %v603_v61 = vpop.eup %602 }
  0x16   :  { %304 = vmatpush.bf16.msra.mxu2 %v581_v8  ;;  %v567_v22 = vld [vmem:[#allocation5 + $0x40] sm:$0xff]  ;;  %v576_v25 = vld [vmem:[#allocation5 + $0x88] sm:$0xff]  ;;  %367 = vmatpush.bf16.msra.mxu3 %v590_v27  ;;  %v589_v28 = vld [vmem:[#allocation5 + $0xf0] sm:$0xff]  ;;  %v396_v62 = vmul.f32 16.0, %v603_v61  ;;  %vm400_vm3 = vweird.f32 %v603_v61 }
  0x17   :  { %229 = vmatpush.bf16.msra.mxu0 %v564_v6  ;;  %v575_v26 = vld [vmem:[#allocation5 + $0x80] sm:$0xff]  ;;  %v588_v29 = vld [vmem:[#allocation5 + $0xe8] sm:$0xff]  ;;  %v586_v31 = vld [vmem:[#allocation5 + $0xd8] sm:$0xff] }
  0x18   :  { %242 = vmatpush.bf16.msra.mxu1 %v572_v7  ;;  %v127_v23 = vld [vmem:[#allocation1] sm:$0xff]  ;;  %v128_v24 = vld [vmem:[#allocation1 + $0x9] sm:$0xff]  ;;  %v584_v42 = vld [vmem:[#allocation5 + $0xc8] sm:$0xff]  ;;  %v397_v63 = vsub.f32 1.0, %v396_v62 }
  0x19   :  { %v587_v30 = vld [vmem:[#allocation5 + $0xe0] sm:$0xff]  ;;  %v585_v33 = vld [vmem:[#allocation5 + $0xd0] sm:$0xff] }
  0x1a   :  { %305 = vmatpush.bf16.msra.mxu2 %v580_v11  ;;  %368 = vmatpush.bf16.msra.mxu3 %v589_v28  ;;  %v123_v32 = vld [vmem:[#allocation7] sm:$0x7]  ;;  %v398_v3 = vmul.f32 %v603_v61, %v397_v63 }
  0x1b   :  { %230 = vmatpush.bf16.msra.mxu0 %v563_v9  ;;  %v124_v34 = vperm.slane %v123_v32, 0  ;;  %v583_v43 = vld [vmem:[#allocation5 + $0xc0] sm:$0xff]  ;;  %v254_v44 = vperm.slane %v123_v32, 1  ;;  %v318_v52 = vperm.slane %v123_v32, 2 }
  0x1c   :  { %243 = vmatpush.bf16.msra.mxu1 %v571_v10  ;;  %v399_v6 = vadd.f32 %v603_v61, %v398_v3 }
  0x1e   :  { %306 = vmatpush.bf16.msra.mxu2 %v579_v14  ;;  %369 = vmatpush.bf16.msra.mxu3 %v588_v29  ;;  %v401_v9 = vsel %vm400_vm3, %v603_v61, %v399_v6 }
  0x1f   :  { %231 = vmatpush.bf16.msra.mxu0 %v562_v12 }
  0x20   :  { %244 = vmatpush.bf16.msra.mxu1 %v570_v13 }
  0x22   :  { %307 = vmatpush.bf16.msra.mxu2 %v578_v17  ;;  %370 = vmatpush.bf16.msra.mxu3 %v587_v30 }
  0x23   :  { %232 = vmatpush.bf16.msra.mxu0 %v561_v15 }
  0x24   :  { %245 = vmatpush.bf16.msra.mxu1 %v569_v16 }
  0x26   :  { %308 = vmatpush.bf16.msra.mxu2 %v577_v20  ;;  %371 = vmatpush.bf16.msra.mxu3 %v586_v31 }
  0x27   :  { %233 = vmatpush.bf16.msra.mxu0 %v560_v18 }
  0x28   :  { %246 = vmatpush.bf16.msra.mxu1 %v568_v19 }
  0x2a   :  { %309 = vmatpush.bf16.msra.mxu2 %v576_v25  ;;  %372 = vmatpush.bf16.msra.mxu3 %v585_v33 }
  0x2b   :  { %234 = vmatpush.bf16.msra.mxu0 %v559_v21 }
  0x2c   :  { %247 = vmatpush.bf16.msra.mxu1 %v567_v22 }
  0x2e   :  { %235 = vmatmul.bf16.vlgmr.msra.gmra.mxu0 %v127_v23  ;;  %310 = vmatpush.bf16.msra.mxu2 %v575_v26 }
  0x2f   :  { %248 = vmatmul.bf16.vlgmr.msra.gmra.mxu1 %v128_v24  ;;  %373 = vmatpush.bf16.msra.mxu3 %v584_v42 }
  0x33   :  { %374 = vmatpush.bf16.msra.mxu3 %v583_v43 }
  0xab   :  { %v236_v35 = vpop.f32.mrf.mxu0 }
  0xac   :  { %v249_v36 = vpop.f32.mrf.mxu1  ;;  %v237_v37 = vadd.f32 %v236_v35, %v124_v34 }
  0xae   :  { %v250_v38 = vadd.f32 %v249_v36, %v237_v37 }
  0xb0   :  { %v253_v39 = vpack.c.bf16 %v250_v38, %v250_v38 }
  0xb2   :  { %311 = vmatmul.bf16.vlgmr.msra.gmra.mxu2 %v253_v39 }
  0xb3   :  { %v238_v40 = vpop.f32.mrf.mxu0 }
  0xb4   :  { %v251_v41 = vpop.f32.mrf.mxu1 }
 0x135   :  { %v312_v45 = vpop.f32.mrf.mxu2 }
 0x136   :  { %v313_v46 = vadd.f32 %v312_v45, %v254_v44 }
 0x138   :  { %v316_v47 = vmax.f32 %v313_v46, 0.0 }
 0x13a   :  { %v317_v48 = vpack.c.bf16 %v316_v47, %v316_v47 }
 0x13c   :  { %375 = vmatmul.bf16.vlgmr.msra.gmra.mxu3 %v317_v48 }
 0x13d   :  { %v314_v49 = vpop.f32.mrf.mxu2 }
 0x1bf   :  { %v376_v53 = vpop.f32.mrf.mxu3 }
 0x1c0   :  { %v377_v54 = vadd.f32 %v376_v53, %v318_v52 }
 0x1c2   :  { %v383_v55 = vsel %vm382_vm0, %v377_v54, 0.0  ;;  %v405_v58 = vsel %vm404_vm2, %v377_v54, 0.0 }
 0x1c3   :  { %v385_v56 = vsel %vm384_vm1, %v383_v55, 0.0  ;;  %v406_v59 = vsel %vm384_vm1, %v405_v58, 0.0 }
 0x1c4   :  { %386 = vadd.xlane.f32.xlu0 %v385_v56 }
 0x1c7   :  { %v378_v57 = vpop.f32.mrf.mxu3 }
 0x1cc   :  { %407 = vadd.xlane.f32.xlu0 %v406_v59 }
 0x237   :  { %v387_v0 = vpop.xlane.xlu0 %386 }
 0x238   :  { %v388_v1 = vrot.slane %v387_v0, 4 }
 0x23a   :  { %v389_v2 = vadd.f32 %v388_v1, %v387_v0 }
 0x23c   :  { %v390_v4 = vrot.slane %v389_v2, 2 }
 0x23e   :  { %v391_v5 = vadd.f32 %v390_v4, %v389_v2 }
 0x23f   :  { %v408_v12 = vpop.xlane.xlu0 %407 }
 0x240   :  { %v392_v7 = vrot.slane %v391_v5, 1 }
 0x242   :  { %v393_v8 = vadd.f32 %v392_v7, %v391_v5 }
 0x244   :  { %591 = vpush %v393_v8 }
 0x245   :  { %593 = vpush %v401_v9 }
 0x275   :  { %s592_s0 = spop %591 }
 0x276   :  { %s594_s2 = spop %593 }
 0x277   :  { %s403_s28 = smul.f32 %s594_s2, %s592_s0 }
 0x279   :  { %v409_v10 = vstv %s403_s28 }
 0x27a   :  { %v410_v11 = vsub.f32 %v377_v54, %v409_v10 }
 0x27c   :  { %v411_v13 = vadd.f32 %v410_v11, %v408_v12 }
 0x27e   :  { %412 = vst [vmem:[#allocation8] sm:$0x3] %v411_v13 }
 0x27f   :  { %423 = dma.vmem_to_hbm [thread:$0]  %s419_s30, 32, %s421_s6, [#allocation4]  }
 0x280   :  { %704 = dma.done.wait [#allocation4], 32  }
 0x281   :  { %705 = vsyncadd [#allocation4], 4294967264 }
 0x282   :  { %428 = vsyncpa [#allocation3], 1 }
 0x283   :  { %429 = vsyncpa [#allocation6], 1 }
 0x284   :  { %430 = vsyncpa [#allocation4], 1 }

</bundles_post_ra>
